<compile_context>
chip_gen: v6e
topology: v6e:2x2x1
jax: 0.10.0
libtpu: 0.0.40
codegen_flags: <defaults>
</compile_context>

<pallas_src>
import functools

import jax
import jax.numpy as jnp
from jax.experimental import pallas as pl
from jax.experimental.pallas import tpu as pltpu

LN_EPS = 1e-5  # PyTorch nn.LayerNorm default


def _round_up(x, m):
    return ((x + m - 1) // m) * m


def _vmem_capacity_bytes():
    """Per-TensorCore VMEM capacity; conservative 64 MiB if the probe fails."""
    if hasattr(pltpu, "get_tpu_info"):
        try:
            cap = int(pltpu.get_tpu_info().vmem_capacity_bytes)
            if cap > 0:
                return cap
        except Exception:  # hardware *probe* only -- never masks kernel errors
            pass
    return 64 << 20


@functools.lru_cache(maxsize=None)
def _buffered_single_supported():
    """One-time feature probe for pl.Buffered / BlockSpec(pipeline_mode=...)."""
    if not hasattr(pl, "Buffered"):
        return False
    try:
        pl.BlockSpec((8, 128), lambda i: (0, 0), pipeline_mode=pl.Buffered(1))
    except TypeError:
        return False
    return True


def _prenorm_linear_kernel(x_ref, gamma_ref, beta_ref, w_ref, b_ref, o_ref, *,
                           d_true, mxu_dtype):
    """One grid step: (tm, Dp) row tile x (Dp, tn) weight column tile.

    x_ref     : (tm, Dp)  input rows (feature dim zero-padded to Dp)
    gamma_ref : (1, Dp)   LayerNorm weight (f32, zero-padded)
    beta_ref  : (1, Dp)   LayerNorm bias   (f32, zero-padded)
    w_ref     : (Dp, tn)  Linear weight column tile (in x out layout, padded)
    b_ref     : (1, tn)   Linear bias column tile (f32, padded)
    o_ref     : (tm, tn)  output tile
    """
    x = x_ref[...].astype(jnp.float32)
    dp = x.shape[-1]
    inv_d = jnp.float32(1.0 / d_true)

    # --- LayerNorm over the true feature width d_true (padding lanes are 0) --
    mean = jnp.sum(x, axis=-1, keepdims=True) * inv_d
    xc = x - mean
    if dp != d_true:  # zero padded lanes so they don't pollute the variance
        lane = jax.lax.broadcasted_iota(jnp.int32, x.shape, dimension=1)
        xc = jnp.where(lane < d_true, xc, 0.0)
    var = jnp.sum(xc * xc, axis=-1, keepdims=True) * inv_d
    xn = xc * jax.lax.rsqrt(var + LN_EPS)
    xn = xn * gamma_ref[...] + beta_ref[...]  # padded lanes stay 0 (beta pad=0)

    # --- fn = Linear: MXU fed in promote(x, w) dtype, f32 accumulate ---------
    y = jnp.dot(xn.astype(mxu_dtype), w_ref[...].astype(mxu_dtype),
                preferred_element_type=jnp.float32)
    y = y + b_ref[...]
    o_ref[...] = y.astype(o_ref.dtype)


def prenorm_linear(x, gamma, beta, w, b, *, tm=None, tn=None,
                   vmem_target_bytes=None):
    """x: [B, S, D]; gamma/beta: [D]; w: [D, D] (in x out layout); b: [D]."""
    B, S, D = x.shape
    R = B * S

    x_itemsize = jnp.dtype(x.dtype).itemsize
    w_itemsize = jnp.dtype(w.dtype).itemsize
    out_itemsize = x_itemsize
    mxu_dtype = jnp.promote_types(x.dtype, w.dtype)

    # Lane-dense feature width.
    Dp = _round_up(D, 128)

    # --- generation-aware VMEM planning --------------------------------------
    vmem_cap = _vmem_capacity_bytes()
    if vmem_target_bytes is None:
        vmem_target_bytes = int(vmem_cap * 0.75)

    buffered_ok = _buffered_single_supported()

    # Output-column tile: keep the full-width weight block resident (single
    # buffered) whenever it fits in ~40% of VMEM; otherwise column-tile it.
    # Candidates prefer 256-multiples (v6e/v7x MXU is 256-wide); 128 fallback.
    tn_candidates = []
    for t in (Dp, 2048, 1024, 512, 256, 128):
        if t <= Dp and Dp % t == 0 and t not in tn_candidates:
            tn_candidates.append(t)
    if tn is None:
        if Dp * Dp * w_itemsize <= int(0.40 * vmem_cap):
            tn = Dp
        else:
            tn = next((t for t in tn_candidates if t < Dp), Dp)
    assert Dp % tn == 0, "tn must divide the padded feature width"

    # Row tile: large in the HBM-bound small-D regime, clamped to the padded
    # row count; shrunk jointly with tn below to respect the VMEM budget.
    if tm is None:
        tm = 1024 if Dp <= 1024 else (512 if Dp <= 2048 else 256)
    tm = max(16, min(_round_up(tm, 16), _round_up(R, 16)))
    tm_floor = min(tm, 64)

    def working_set(tm_, tn_):
        f32 = 4
        w_bufs = 1 if (tn_ == Dp and buffered_ok) else 2
        ln_tmp = 3 * tm_ * Dp * f32            # f32 x / xc / xn temporaries
        mm_tmp = tm_ * tn_ * f32               # f32 accumulator before cast
        if mxu_dtype != jnp.dtype(w.dtype):
            mm_tmp += Dp * tn_ * f32           # in-kernel W up-cast
        return (2 * tm_ * Dp * x_itemsize          # x tile, double buffered
                + 2 * tm_ * tn_ * out_itemsize     # out tile, double buffered
                + w_bufs * Dp * tn_ * w_itemsize   # weight column tile
                + 2 * (2 * Dp + tn_) * f32         # gamma / beta / bias
                + ln_tmp + mm_tmp)

    # Joint tm / tn shrink until the working set fits the budget.
    while working_set(tm, tn) > vmem_target_bytes:
        x_part = (2 * tm * Dp * x_itemsize + 2 * tm * tn * out_itemsize
                  + 3 * tm * Dp * 4 + tm * tn * 4)
        w_bufs = 1 if (tn == Dp and buffered_ok) else 2
        w_part = w_bufs * Dp * tn * w_itemsize
        smaller_tn = [t for t in tn_candidates if t < tn]
        if tm > tm_floor and (x_part >= w_part or not smaller_tn):
            tm = max(tm_floor, _round_up(tm // 2, 16))
        elif smaller_tn:
            tn = smaller_tn[0]
        else:
            break

    Rp = _round_up(R, tm)
    n_i = Rp // tm
    n_j = Dp // tn
    w_is_grid_invariant = (tn == Dp)

    # Grid order: the operand that would be re-streamed more from HBM goes on
    # the OUTER axis (its block index then only changes at outer steps).  For
    # large D this keeps W streamed exactly once instead of once per row tile.
    rows_inner = False
    if n_j > 1:
        extra_w_if_cols_inner = (n_i - 1) * Dp * Dp * w_itemsize
        extra_x_if_rows_inner = (n_j - 1) * Rp * Dp * x_itemsize
        rows_inner = extra_x_if_rows_inner < extra_w_if_cols_inner

    # --- padding: pure layout plumbing; padded rows/cols are sliced off ------
    x2 = x.reshape(R, D)
    if (Rp, Dp) != (R, D):
        x2 = jnp.pad(x2, ((0, Rp - R), (0, Dp - D)))
    g2 = jnp.pad(gamma.astype(jnp.float32), (0, Dp - D)).reshape(1, Dp)
    be2 = jnp.pad(beta.astype(jnp.float32), (0, Dp - D)).reshape(1, Dp)
    w2 = jnp.pad(w, ((0, Dp - D), (0, Dp - D)))
    b2 = jnp.pad(b.astype(jnp.float32), (0, Dp - D)).reshape(1, Dp)

    kernel = functools.partial(_prenorm_linear_kernel, d_true=D,
                               mxu_dtype=mxu_dtype)

    vmem_limit = int(min(max(working_set(tm, tn) * 1.3 + (4 << 20), 32 << 20),
                         vmem_cap * 0.9))
    n_w_streams = 1 if (rows_inner or n_j == 1) else n_i
    cost = pl.CostEstimate(
        flops=2 * R * D * D + 8 * R * D,
        transcendentals=R,
        bytes_accessed=(Rp * Dp * (x_itemsize * (n_j if rows_inner else 1)
                                   + out_itemsize)
                        + n_w_streams * Dp * Dp * w_itemsize + 12 * Dp),
    )

    # Both grid axes are fully parallel (no reduction axis): megacore chips
    # (v7x) may shard either one.
    if rows_inner:
        grid = (n_j, n_i)
        x_map = lambda j, i: (i, 0)
        p_map = lambda j, i: (0, 0)            # gamma / beta
        w_map = lambda j, i: (0, j)
        b_map = lambda j, i: (0, j)
        o_map = lambda j, i: (i, j)
    else:
        grid = (n_i, n_j)
        x_map = lambda i, j: (i, 0)
        p_map = lambda i, j: (0, 0)
        w_map = lambda i, j: (0, j)
        b_map = lambda i, j: (0, j)
        o_map = lambda i, j: (i, j)

    def build(single_buffer_invariants):
        def spec(shape, imap, invariant=False):
            if single_buffer_invariants and invariant:
                return pl.BlockSpec(shape, imap, pipeline_mode=pl.Buffered(1))
            return pl.BlockSpec(shape, imap)

        return pl.pallas_call(
            kernel,
            out_shape=jax.ShapeDtypeStruct((Rp, Dp), x.dtype),
            grid_spec=pltpu.PrefetchScalarGridSpec(
                num_scalar_prefetch=0,
                grid=grid,
                in_specs=[
                    spec((tm, Dp), x_map),                                # x
                    spec((1, Dp), p_map, invariant=True),                 # gamma
                    spec((1, Dp), p_map, invariant=True),                 # beta
                    spec((Dp, tn), w_map, invariant=w_is_grid_invariant),  # W
                    spec((1, tn), b_map, invariant=w_is_grid_invariant),   # b
                ],
                out_specs=pl.BlockSpec((tm, tn), o_map),
            ),
            compiler_params=pltpu.CompilerParams(
                dimension_semantics=("parallel", "parallel"),
                vmem_limit_bytes=vmem_limit),
            cost_estimate=cost,
        )

    try:
        out = build(buffered_ok)(x2, g2, be2, w2, b2)
    except (pltpu.LoweringException, NotImplementedError, TypeError,
            ValueError):
        # Only a Buffered(1) lowering rejection is retried with default
        # buffering; genuine failures (VMEM OOM etc.) propagate unchanged.
        if not buffered_ok:
            raise
        out = build(False)(x2, g2, be2, w2, b2)

    return out[:R, :D].reshape(B, S, D)


def prenorm_linear_ref(x, gamma, beta, w, b):
    """Pure-JAX reference matching PyTorch PreNorm(dim, nn.Linear(dim, dim))."""
    xf = x.astype(jnp.float32)
    mean = jnp.mean(xf, axis=-1, keepdims=True)
    var = jnp.mean((xf - mean) ** 2, axis=-1, keepdims=True)
    xn = (xf - mean) * jax.lax.rsqrt(var + LN_EPS)
    xn = xn * gamma.astype(jnp.float32) + beta.astype(jnp.float32)
    y = xn @ w.astype(jnp.float32) + b.astype(jnp.float32)
    return y.astype(x.dtype)


if __name__ == "__main__":
    key = jax.random.PRNGKey(0)
    B, S, D = 2, 8, 32
    k1, k2, k3 = jax.random.split(key, 3)

    x = jax.random.normal(k1, (B, S, D), dtype=jnp.float32)

    # LayerNorm init: gamma=1, beta=0 (PyTorch default); Linear: random.
    gamma = jnp.ones((D,), dtype=jnp.float32)
    beta = jnp.zeros((D,), dtype=jnp.float32)
    w = jax.random.normal(k2, (D, D), dtype=jnp.float32) * (1.0 / D ** 0.5)
    b = jax.random.normal(k3, (D,), dtype=jnp.float32) * 0.01

    # f32 path
    y = jax.block_until_ready(prenorm_linear(x, gamma, beta, w, b))
    y_ref = prenorm_linear_ref(x, gamma, beta, w, b)
    assert jnp.allclose(y, y_ref, atol=1e-4, rtol=1e-4), "f32 mismatch vs reference"

    # bf16 path: LN stays f32, MXU runs bf16 with f32 accumulate.
    xb = x.astype(jnp.bfloat16)
    wb = w.astype(jnp.bfloat16)
    yb = jax.block_until_ready(prenorm_linear(xb, gamma, beta, wb, b))
    yb_ref = prenorm_linear_ref(xb, gamma, beta, wb, b)
    assert jnp.allclose(yb.astype(jnp.float32), yb_ref.astype(jnp.float32),
                        atol=1e-1, rtol=1e-1), "bf16 mismatch vs reference"

    print("KERNEL_OK")
</pallas_src>

<mosaic_0001>
module attributes {stable_mosaic.version = 11 : i64} {
  func.func @_prenorm_linear_kernel(%arg0: i32, %arg1: i32, %arg2: memref<16x128xf32, #tpu.memory_space<vmem>>, %arg3: memref<1x128xf32, #tpu.memory_space<vmem>>, %arg4: memref<1x128xf32, #tpu.memory_space<vmem>>, %arg5: memref<128x128xf32, #tpu.memory_space<vmem>>, %arg6: memref<1x128xf32, #tpu.memory_space<vmem>>, %arg7: memref<16x128xf32, #tpu.memory_space<vmem>>) attributes {dimension_semantics = [#tpu.dimension_semantics<parallel>, #tpu.dimension_semantics<parallel>], iteration_bounds = array<i64: 1, 1>, scalar_prefetch = 0 : i64, scratch_operands = 0 : i64, tpu.core_type = #tpu.core_type<tc>, window_params = [{transform_indices = @transform_0, window_bounds = array<i64: 16, 128>}, {pipeline_mode = #tpu.pipeline_mode<synchronous>, transform_indices = @transform_1, window_bounds = array<i64: 1, 128>}, {pipeline_mode = #tpu.pipeline_mode<synchronous>, transform_indices = @transform_2, window_bounds = array<i64: 1, 128>}, {pipeline_mode = #tpu.pipeline_mode<synchronous>, transform_indices = @transform_3, window_bounds = array<i64: 128, 128>}, {pipeline_mode = #tpu.pipeline_mode<synchronous>, transform_indices = @transform_4, window_bounds = array<i64: 1, 128>}, {transform_indices = @transform_5, window_bounds = array<i64: 16, 128>}]} {
    %c0 = arith.constant 0 : index
    %c0_0 = arith.constant 0 : index
    %0 = vector.load %arg2[%c0, %c0_0] : memref<16x128xf32, #tpu.memory_space<vmem>>, vector<16x128xf32>
    %cst = arith.constant dense<0.000000e+00> : vector<16xf32>
    %1 = vector.multi_reduction <add>, %0, %cst [1] : vector<16x128xf32> to vector<16xf32>
    %2 = vector.shape_cast %1 : vector<16xf32> to vector<16x1xf32>
    %cst_1 = arith.constant 3.125000e-02 : f32
    %3 = vector.broadcast %cst_1 : f32 to vector<16x1xf32>
    %4 = arith.mulf %2, %3 : vector<16x1xf32>
    %5 = vector.broadcast %4 : vector<16x1xf32> to vector<16x128xf32>
    %6 = arith.subf %0, %5 : vector<16x128xf32>
    %7 = tpu.iota {dimensions = array<i32: 1>} : vector<16x128xi32>
    %c32_i32 = arith.constant 32 : i32
    %8 = vector.broadcast %c32_i32 : i32 to vector<16x128xi32>
    %9 = arith.cmpi slt, %7, %8 : vector<16x128xi32>
    %cst_2 = arith.constant 0.000000e+00 : f32
    %10 = vector.broadcast %cst_2 : f32 to vector<16x128xf32>
    %11 = arith.select %9, %6, %10 : vector<16x128xi1>, vector<16x128xf32>
    %12 = arith.mulf %11, %11 : vector<16x128xf32>
    %cst_3 = arith.constant dense<0.000000e+00> : vector<16xf32>
    %13 = vector.multi_reduction <add>, %12, %cst_3 [1] : vector<16x128xf32> to vector<16xf32>
    %14 = vector.shape_cast %13 : vector<16xf32> to vector<16x1xf32>
    %cst_4 = arith.constant 3.125000e-02 : f32
    %15 = vector.broadcast %cst_4 : f32 to vector<16x1xf32>
    %16 = arith.mulf %14, %15 : vector<16x1xf32>
    %cst_5 = arith.constant 9.99999974E-6 : f32
    %17 = vector.broadcast %cst_5 : f32 to vector<16x1xf32>
    %18 = arith.addf %16, %17 : vector<16x1xf32>
    %19 = math.rsqrt %18 : vector<16x1xf32>
    %20 = vector.broadcast %19 : vector<16x1xf32> to vector<16x128xf32>
    %21 = arith.mulf %11, %20 : vector<16x128xf32>
    %c0_6 = arith.constant 0 : index
    %c0_7 = arith.constant 0 : index
    %22 = vector.load %arg3[%c0_6, %c0_7] : memref<1x128xf32, #tpu.memory_space<vmem>>, vector<1x128xf32>
    %23 = vector.broadcast %22 : vector<1x128xf32> to vector<16x128xf32>
    %24 = arith.mulf %21, %23 : vector<16x128xf32>
    %c0_8 = arith.constant 0 : index
    %c0_9 = arith.constant 0 : index
    %25 = vector.load %arg4[%c0_8, %c0_9] : memref<1x128xf32, #tpu.memory_space<vmem>>, vector<1x128xf32>
    %26 = vector.broadcast %25 : vector<1x128xf32> to vector<16x128xf32>
    %27 = arith.addf %24, %26 : vector<16x128xf32>
    %c0_10 = arith.constant 0 : index
    %c0_11 = arith.constant 0 : index
    %28 = vector.load %arg5[%c0_10, %c0_11] : memref<128x128xf32, #tpu.memory_space<vmem>>, vector<128x128xf32>
    %cst_12 = arith.constant dense<0.000000e+00> : vector<16x128xf32>
    %29 = tpu.matmul %27, %28, %cst_12 {dimension_numbers = #tpu.dot_dimension_numbers<[1], [0], [0], [1], [0, 0, 1, 1], [], []>} : vector<16x128xf32>, vector<128x128xf32>, vector<16x128xf32> -> vector<16x128xf32>
    %c0_13 = arith.constant 0 : index
    %c0_14 = arith.constant 0 : index
    %30 = vector.load %arg6[%c0_13, %c0_14] : memref<1x128xf32, #tpu.memory_space<vmem>>, vector<1x128xf32>
    %31 = vector.broadcast %30 : vector<1x128xf32> to vector<16x128xf32>
    %32 = arith.addf %29, %31 : vector<16x128xf32>
    %c0_15 = arith.constant 0 : index
    %c0_16 = arith.constant 0 : index
    %33 = vector.load %arg7[%c0_15, %c0_16] : memref<16x128xf32, #tpu.memory_space<vmem>>, vector<16x128xf32>
    tpu.vector_store %arg7[%c0_15, %c0_16], %32 {strides = array<i32>} : memref<16x128xf32, #tpu.memory_space<vmem>>, vector<16x128xf32>,
    return
  }
  func.func @transform_0(%arg0: i32, %arg1: i32) -> (i32, i32) {
    %c0_i32 = arith.constant 0 : i32
    %c0_i32_0 = arith.constant 0 : i32
    return %arg0, %c0_i32 : i32, i32
  }
  func.func @transform_1(%arg0: i32, %arg1: i32) -> (i32, i32) {
    %c0_i32 = arith.constant 0 : i32
    %c0_i32_0 = arith.constant 0 : i32
    %c0_i32_1 = arith.constant 0 : i32
    return %c0_i32, %c0_i32_0 : i32, i32
  }
  func.func @transform_2(%arg0: i32, %arg1: i32) -> (i32, i32) {
    %c0_i32 = arith.constant 0 : i32
    %c0_i32_0 = arith.constant 0 : i32
    %c0_i32_1 = arith.constant 0 : i32
    return %c0_i32, %c0_i32_0 : i32, i32
  }
  func.func @transform_3(%arg0: i32, %arg1: i32) -> (i32, i32) {
    %c0_i32 = arith.constant 0 : i32
    %c0_i32_0 = arith.constant 0 : i32
    return %c0_i32, %arg1 : i32, i32
  }
  func.func @transform_4(%arg0: i32, %arg1: i32) -> (i32, i32) {
    %c0_i32 = arith.constant 0 : i32
    %c0_i32_0 = arith.constant 0 : i32
    return %c0_i32, %arg1 : i32, i32
  }
  func.func @transform_5(%arg0: i32, %arg1: i32) -> (i32, i32) {
    %c0_i32 = arith.constant 0 : i32
    return %arg0, %arg1 : i32, i32
  }
}

</mosaic_0001>

<bundles_post_ra>
// kernel: tpu_custom_call.1
= control target key start
LH: loop header
LB: loop body
LE: loop exit
PB: predicated region body
PF: predicated region fallthrough
CT: control target
= control target key end

     0   :  { %10 = vsyncpa [#allocation3], 0  ;;  %s407_s0 = inlined_call_operand.hbm [shape: f32[16,128], index: 0, kind: input, shape index: {}]   ;;  %s408_s1 = inlined_call_operand.vmem [shape: f32[1,128], index: 1, kind: input, shape index: {}]   ;;  %s409_s2 = inlined_call_operand.vmem [shape: f32[1,128], index: 2, kind: input, shape index: {}]   ;;  %s410_s3 = inlined_call_operand.hbm [shape: f32[128,128], index: 3, kind: input, shape index: {}]   ;;  %s411_s4 = inlined_call_operand.vmem [shape: f32[1,128], index: 4, kind: input, shape index: {}]   ;;  %s412_s5 = inlined_call_operand.hbm [shape: f32[16,128], index: 5, kind: output, shape index: {}]  }
   0x1   :  { %11 = vsyncpa [#allocation6], 0 }
   0x2   :  { %12 = vsyncpa [#allocation4], 0  ;;  %s345_s18 = smov [#allocation2]  }
   0x3   :  { %s18_s19 = sshll.u32 %s345_s18, 4  ;;  %s19_s19 = int_to_ptr.vmem [resolvable:$true] %s18_s19 }
   0x4   :  { %s287_s20 = scalar_lea.vmem %s19_s19, 256  ;;  %p292_p1 = scmp.lt.s32.totalorder %s19_s19, %s19_s19 }
   0x5   :  { %p288_p0 = scmp.ne.s32.totalorder %s19_s19, %s287_s20  ;;  %p293_p2 = scmp.lt.s32.totalorder %s287_s20, %s287_s20 }
   0x7   :  { %p294_p3 = por %p293_p2, %p292_p1 }
   0x9   :  { %p295_p4 = pnand %p294_p3, %p288_p0 }
   0xb   :  { %298 = shalt.err (!%p295_p4)
}
   0xc   :  { %s346_s21 = smov 128   ;;  %s347_s22 = smov 8  }
   0xd   :  { %24 = dma.hbm_to_vmem [thread:$0]  %s407_s0, 256, %s19_s19, [#allocation3], %s346_s21, %s346_s21, %s347_s22  }
   0xe   :  { %s348_s25 = smov [#allocation5]  }
   0xf   :  { %s34_s26 = sshll.u32 %s348_s25, 4  ;;  %s35_s26 = int_to_ptr.vmem [resolvable:$true] %s34_s26 }
  0x10   :  { %s307_s27 = scalar_lea.vmem %s35_s26, 2048  ;;  %p312_p6 = scmp.lt.s32.totalorder %s35_s26, %s35_s26 }
  0x11   :  { %p308_p5 = scmp.ne.s32.totalorder %s35_s26, %s307_s27  ;;  %p313_p7 = scmp.lt.s32.totalorder %s307_s27, %s307_s27 }
  0x13   :  { %p314_p8 = por %p313_p7, %p312_p6 }
  0x15   :  { %p315_p9 = pnand %p314_p8, %p308_p5 }
  0x17   :  { %318 = shalt.err (!%p315_p9)
}
  0x18   :  { %40 = dma.hbm_to_vmem [thread:$0]  %s410_s3, 2048, %s35_s26, [#allocation6], %s346_s21, %s346_s21, %s347_s22  }
  0x19   :  { %339 = dma.done.wait [#allocation3], 256  }
  0x1a   :  { %340 = vsyncadd [#allocation3], 4294967040 }
  0x1b   :  { %341 = dma.done.wait [#allocation6], 2048  }
  0x1c   :  { %342 = vsyncadd [#allocation6], 4294965248  ;;  %v49_v0 = vld [vmem:[#allocation2] sm:$0xff]  ;;  %v50_v1 = vld [vmem:[#allocation2 + $0x8] sm:$0xff]  ;;  %v59_v4 = vlaneseq  ;;  %s349_s9 = smov [#allocation7]  }
  0x1d   :  { %51 = vadd.xlane.f32.xlu0 %v49_v0  ;;  %v111_v2 = vld [vmem:[#allocation5 + $0x78] sm:$0xff]  ;;  %v110_v3 = vld [vmem:[#allocation5 + $0x70] sm:$0xff]  ;;  %v109_v16 = vld [vmem:[#allocation5 + $0x68] sm:$0xff] }
  0x1e   :  { %235 = vmatprep.subr.mxu0 %v111_v2  ;;  %v60_v5 = vand.u32 127, %v59_v4  ;;  %v108_v17 = vld [vmem:[#allocation5 + $0x60] sm:$0xff]  ;;  %v107_v18 = vld [vmem:[#allocation5 + $0x58] sm:$0xff]  ;;  %v106_v19 = vld [vmem:[#allocation5 + $0x50] sm:$0xff] }
  0x1f   :  { %236 = vmatpush3.msra.mxu0 %v111_v2  ;;  %v105_v20 = vld [vmem:[#allocation5 + $0x48] sm:$0xff]  ;;  %v104_v21 = vld [vmem:[#allocation5 + $0x40] sm:$0xff]  ;;  %v103_v22 = vld [vmem:[#allocation5 + $0x38] sm:$0xff] }
  0x20   :  { %237 = vmatprep.subr.mxu0 %v110_v3  ;;  %vm61_vm0 = vcmp.lt.s32.totalorder %v60_v5, 32  ;;  %v102_v23 = vld [vmem:[#allocation5 + $0x30] sm:$0xff]  ;;  %v101_v24 = vld [vmem:[#allocation5 + $0x28] sm:$0xff]  ;;  %v100_v25 = vld [vmem:[#allocation5 + $0x20] sm:$0xff] }
  0x21   :  { %53 = vadd.xlane.f32.xlu0 %v50_v1  ;;  %238 = vmatpush3.msra.mxu0 %v110_v3  ;;  %v99_v26 = vld [vmem:[#allocation5 + $0x18] sm:$0xff]  ;;  %v98_v27 = vld [vmem:[#allocation5 + $0x10] sm:$0xff]  ;;  %v97_v28 = vld [vmem:[#allocation5 + $0x8] sm:$0xff] }
  0x22   :  { %239 = vmatprep.subr.mxu0 %v109_v16  ;;  %v96_v29 = vld [vmem:[#allocation5] sm:$0xff]  ;;  %v214_v37 = vld [vmem:[%s408_s1] ss:$0 sm:$0xff]  ;;  %s201_s1 = sshll.u32 %s349_s9, 4  ;;  %s202_s1 = int_to_ptr.vmem [resolvable:$true] %s201_s1 }
  0x23   :  { %240 = vmatpush3.msra.mxu0 %v109_v16  ;;  %v215_v39 = vld [vmem:[%s409_s2] ss:$0 sm:$0xff]  ;;  %s319_s2 = scalar_lea.vmem %s202_s1, 256  ;;  %p324_p11 = scmp.lt.s32.totalorder %s202_s1, %s202_s1 }
  0x24   :  { %241 = vmatprep.subr.mxu0 %v108_v17  ;;  %v216_v46 = vld [vmem:[%s411_s4] ss:$0 sm:$0xff]  ;;  %p320_p10 = scmp.ne.s32.totalorder %s202_s1, %s319_s2  ;;  %p325_p12 = scmp.lt.s32.totalorder %s319_s2, %s319_s2 }
  0x25   :  { %242 = vmatpush3.msra.mxu0 %v108_v17 }
  0x26   :  { %243 = vmatprep.subr.mxu0 %v107_v18  ;;  %p326_p13 = por %p325_p12, %p324_p11 }
  0x27   :  { %244 = vmatpush3.msra.mxu0 %v107_v18 }
  0x28   :  { %245 = vmatprep.subr.mxu0 %v106_v19  ;;  %p327_p0 = pnand %p326_p13, %p320_p10 }
  0x29   :  { %246 = vmatpush3.msra.mxu0 %v106_v19 }
  0x2a   :  { %247 = vmatprep.subr.mxu0 %v105_v20 }
  0x2b   :  { %248 = vmatpush3.msra.mxu0 %v105_v20 }
  0x2c   :  { %249 = vmatprep.subr.mxu0 %v104_v21 }
  0x2d   :  { %250 = vmatpush3.msra.mxu0 %v104_v21 }
  0x2e   :  { %251 = vmatprep.subr.mxu0 %v103_v22 }
  0x2f   :  { %252 = vmatpush3.msra.mxu0 %v103_v22 }
  0x30   :  { %253 = vmatprep.subr.mxu0 %v102_v23 }
  0x31   :  { %254 = vmatpush3.msra.mxu0 %v102_v23 }
  0x32   :  { %255 = vmatprep.subr.mxu0 %v101_v24 }
  0x33   :  { %256 = vmatpush3.msra.mxu0 %v101_v24 }
  0x34   :  { %257 = vmatprep.subr.mxu0 %v100_v25 }
  0x35   :  { %258 = vmatpush3.msra.mxu0 %v100_v25 }
  0x36   :  { %259 = vmatprep.subr.mxu0 %v99_v26 }
  0x37   :  { %260 = vmatpush3.msra.mxu0 %v99_v26 }
  0x38   :  { %261 = vmatprep.subr.mxu0 %v98_v27 }
  0x39   :  { %262 = vmatpush3.msra.mxu0 %v98_v27 }
  0x3a   :  { %263 = vmatprep.subr.mxu0 %v97_v28 }
  0x3b   :  { %264 = vmatpush3.msra.mxu0 %v97_v28 }
  0x3c   :  { %265 = vmatprep.subr.mxu0 %v96_v29 }
  0x3d   :  { %266 = vmatpush3.msra.mxu0 %v96_v29 }
  0xa6   :  { %v52_v6 = vpop.xlane.xlu0 %51 }
  0xa7   :  { %v55_v7 = vmul.f32 0.03125, %v52_v6 }
  0xa9   :  { %v57_v8 = vsub.f32 %v49_v0, %v55_v7 }
  0xaa   :  { %v54_v9 = vpop.xlane.xlu0 %53 }
  0xab   :  { %v56_v10 = vmul.f32 0.03125, %v54_v9  ;;  %v62_v11 = vsel %vm61_vm0, %v57_v8, 0.0 }
  0xac   :  { %v64_v12 = vmul.f32 %v62_v11, %v62_v11 }
  0xad   :  { %v58_v13 = vsub.f32 %v50_v1, %v56_v10 }
  0xae   :  { %66 = vadd.xlane.f32.xlu1 %v64_v12 }
  0xaf   :  { %v63_v14 = vsel %vm61_vm0, %v58_v13, 0.0 }
  0xb0   :  { %v65_v15 = vmul.f32 %v63_v14, %v63_v14 }
  0xb2   :  { %68 = vadd.xlane.f32.xlu1 %v65_v15 }
 0x137   :  { %v67_v30 = vpop.xlane.xlu1 %66 }
 0x138   :  { %v70_v31 = vmul.f32 0.03125, %v67_v30 }
 0x13a   :  { %v72_v32 = vadd.f32 1e-05, %v70_v31 }
 0x13b   :  { %v69_v33 = vpop.xlane.xlu1 %68 }
 0x13c   :  { %275 = vrsqrt.f32 %v72_v32  ;;  %v71_v34 = vmul.f32 0.03125, %v69_v33 }
 0x13e   :  { %v73_v35 = vadd.f32 1e-05, %v71_v34 }
 0x140   :  { %277 = vrsqrt.f32 %v73_v35 }
 0x149   :  { %v276_v36 = vpop.eup %275 }
 0x14a   :  { %v76_v38 = vmul.f32 %v276_v36, %v62_v11 }
 0x14c   :  { %v85_v40 = vmul.f32 %v214_v37, %v76_v38 }
 0x14d   :  { %v278_v41 = vpop.eup %277 }
 0x14e   :  { %v77_v42 = vmul.f32 %v278_v41, %v63_v14  ;;  %v94_v43 = vadd.f32 %v215_v39, %v85_v40 }
 0x150   :  { %v86_v44 = vmul.f32 %v214_v37, %v77_v42  ;;  %267 = vmatprep.mubr.f32.mxu0 %v94_v43 }
 0x152   :  { %v95_v45 = vadd.f32 %v215_v39, %v86_v44 }
 0x154   :  { %268 = vmatmul.mubr.f32.vlgmr.msra.gmra.mxu0 %v95_v45 }
 0x214   :  { %v269_v47 = vpop.f32.mrf.mxu0 }
 0x215   :  { %v191_v48 = vadd.f32 %v269_v47, %v216_v46 }
 0x216   :  { %v185_v49 = vpop.f32.mrf.mxu0 }
 0x217   :  { %195 = vst [vmem:[#allocation7 + $0x8] sm:$0xff] %v191_v48  ;;  %v186_v50 = vadd.f32 %v216_v46, %v185_v49 }
 0x219   :  { %194 = vst [vmem:[#allocation7] sm:$0xff] %v186_v50 }
 0x21a   :  { %330 = shalt.err (!%p327_p0)
}
 0x21b   :  { %207 = dma.vmem_to_hbm [thread:$0]  %s202_s1, 256, %s412_s5, [#allocation4], %s346_s21, %s346_s21, %s347_s22  }
 0x21c   :  { %343 = dma.done.wait [#allocation4], 256  }
 0x21d   :  { %344 = vsyncadd [#allocation4], 4294967040 }
 0x21e   :  { %211 = vsyncpa [#allocation3], 1 }
 0x21f   :  { %212 = vsyncpa [#allocation6], 1 }
 0x220   :  { %213 = vsyncpa [#allocation4], 1 }

</bundles_post_ra>
